<compile_context>
chip_gen: v5e
topology: v5e:2x2
jax: 0.10.0
libtpu: 0.0.40
codegen_flags: <defaults>
</compile_context>

<pallas_src>
import jax
import jax.numpy as jnp
from jax.experimental import pallas as pl
from jax.experimental.pallas import tpu as pltpu


def mlp_kernel(x_ref, w1_ref, b1_ref, w2_ref, b2_ref, w3_ref, b3_ref, o_ref):
    # Cast the streamed f32 input to the MXU input dtype inside the kernel
    # (avoids an extra XLA pass over x in HBM).
    x = x_ref[...].astype(w1_ref.dtype)
    # fc1 + ReLU (f32 accumulation on the MXU)
    h1 = jnp.dot(x, w1_ref[...], preferred_element_type=jnp.float32)
    h1 = jnp.maximum(h1 + b1_ref[...], 0.0)
    # fc2 + ReLU
    h2 = jnp.dot(h1.astype(w2_ref.dtype), w2_ref[...],
                 preferred_element_type=jnp.float32)
    h2 = jnp.maximum(h2 + b2_ref[...], 0.0)
    # fc3 (logits, unpadded narrow output block)
    out = jnp.dot(h2.astype(w3_ref.dtype), w3_ref[...],
                  preferred_element_type=jnp.float32)
    o_ref[...] = (out + b3_ref[...]).astype(o_ref.dtype)


def _pick_vmem_limit():
    """Generation-aware scoped-VMEM budget: 75% of physical, capped at 96 MiB.

    -> ~96 MiB on v5e/v6e (128 MiB physical), ~48 MiB on v7x (64 MiB physical).
    """
    default = 48 * 1024 * 1024
    try:
        cap = int(pltpu.get_tpu_info().vmem_capacity_bytes)
    except Exception:
        return default
    return max(default, min(96 * 1024 * 1024, (cap * 3) // 4))


def _pick_tile_b(B, tile_b):
    """Batch tile: multiple of 8, large enough to amortize per-step overhead,
    and (for B > 16) at least 2 grid steps so v7x's two TCs both get work."""
    if B <= 16:
        return B  # single block: block dim == full array dim is legal
    half = 8 * pl.cdiv(pl.cdiv(B, 2), 8)
    return min(tile_b, half)


def style_classifier_forward(x, params, *, tile_b=8192, compute_dtype=jnp.bfloat16):
    """x: (B, input_features) float32. params: dict of w1,b1,w2,b2,w3,b3.

    Weights are stored (in_features, out_features); biases (1, out_features).
    Returns (B, num_styles) float32 logits.
    """
    w1, b1 = params["w1"], params["b1"]
    w2, b2 = params["w2"], params["b2"]
    w3, b3 = params["w3"], params["b3"]
    B, f_in = x.shape
    h1_dim = w1.shape[1]
    h2_dim = w2.shape[1]
    num_styles = w3.shape[1]

    # Tiny, call-invariant weights: one-time cast to the MXU input dtype.
    # Biases stay f32 (added on the f32 accumulator).
    w1c = w1.astype(compute_dtype)
    w2c = w2.astype(compute_dtype)
    w3c = w3.astype(compute_dtype)

    tb = _pick_tile_b(B, tile_b)
    grid = (pl.cdiv(B, tb),)

    const2d = lambda arr: pl.BlockSpec(arr.shape, lambda i: (0, 0))

    flops = 2 * B * (f_in * h1_dim + h1_dim * h2_dim + h2_dim * num_styles)
    bytes_accessed = (
        B * f_in * x.dtype.itemsize          # streamed f32 input
        + B * num_styles * 4                 # streamed unpadded f32 logits
        + sum(a.size * a.dtype.itemsize      # resident weights/biases
              for a in (w1c, b1, w2c, b2, w3c, b3))
    )

    out = pl.pallas_call(
        mlp_kernel,
        out_shape=jax.ShapeDtypeStruct((B, num_styles), jnp.float32),
        grid=grid,
        in_specs=[
            pl.BlockSpec((tb, f_in), lambda i: (i, 0)),   # x: streamed per tile
            const2d(w1c), const2d(b1),                    # weights/biases resident
            const2d(w2c), const2d(b2),
            const2d(w3c), const2d(b3),
        ],
        out_specs=pl.BlockSpec((tb, num_styles), lambda i: (i, 0)),
        compiler_params=pltpu.CompilerParams(
            dimension_semantics=("parallel",),
            vmem_limit_bytes=_pick_vmem_limit(),
        ),
        cost_estimate=pl.CostEstimate(
            flops=flops, transcendentals=0, bytes_accessed=bytes_accessed),
    )(x, w1c, b1, w2c, b2, w3c, b3)

    return out


def init_params(key, input_features=32, num_styles=5):
    """Synthetic parameters matching torch Linear shapes / default init range.

    fc1: Linear(input_features, 64), fc2: Linear(64, 32), fc3: Linear(32, num_styles).
    Weights stored (in_features, out_features); biases (1, out_features).
    """
    dims = [(input_features, 64), (64, 32), (32, num_styles)]
    params = {}
    for i, (fan_in, fan_out) in enumerate(dims, start=1):
        key, kw, kb = jax.random.split(key, 3)
        bound = 1.0 / jnp.sqrt(fan_in)
        params[f"w{i}"] = jax.random.uniform(
            kw, (fan_in, fan_out), jnp.float32, minval=-bound, maxval=bound)
        params[f"b{i}"] = jax.random.uniform(
            kb, (1, fan_out), jnp.float32, minval=-bound, maxval=bound)
    return params


def reference_forward(x, params, compute_dtype=jnp.bfloat16):
    """Pure-JAX reference with the same bf16-input / f32-accumulate chain."""
    cd = compute_dtype
    h1 = jnp.maximum(
        jnp.dot(x.astype(cd), params["w1"].astype(cd),
                preferred_element_type=jnp.float32) + params["b1"], 0.0)
    h2 = jnp.maximum(
        jnp.dot(h1.astype(cd), params["w2"].astype(cd),
                preferred_element_type=jnp.float32) + params["b2"], 0.0)
    return jnp.dot(h2.astype(cd), params["w3"].astype(cd),
                   preferred_element_type=jnp.float32) + params["b3"]


if __name__ == "__main__":
    key = jax.random.PRNGKey(0)
    key, kx, kx2 = jax.random.split(key, 3)

    input_features = 32
    num_styles = 5
    params = init_params(key, input_features=input_features, num_styles=num_styles)

    # Small demo batch (matches the module's intended use).
    batch = 2
    x = jax.random.uniform(kx, (batch, input_features), jnp.float32)
    out = jax.block_until_ready(style_classifier_forward(x, params))
    ref = reference_forward(x, params)
    assert out.shape == (batch, num_styles)
    assert jnp.allclose(out, ref, atol=1e-2, rtol=1e-2), \
        "mismatch vs JAX reference (small batch)"

    # Larger, non-tile-aligned batch to exercise the streamed/partial-block
    # grid path (2 grid steps -> both TCs busy on v7x).
    big_batch = 2052
    xb = jax.random.uniform(kx2, (big_batch, input_features), jnp.float32)
    outb = jax.block_until_ready(style_classifier_forward(xb, params))
    refb = reference_forward(xb, params)
    assert outb.shape == (big_batch, num_styles)
    assert jnp.allclose(outb, refb, atol=1e-2, rtol=1e-2), \
        "mismatch vs JAX reference (big batch)"

    print("KERNEL_OK")
</pallas_src>

<mosaic_0001>
module attributes {stable_mosaic.version = 11 : i64} {
  func.func @mlp_kernel(%arg0: i32, %arg1: memref<2x32xf32, #tpu.memory_space<vmem>>, %arg2: memref<32x64xbf16, #tpu.memory_space<vmem>>, %arg3: memref<1x64xf32, #tpu.memory_space<vmem>>, %arg4: memref<64x32xbf16, #tpu.memory_space<vmem>>, %arg5: memref<1x32xf32, #tpu.memory_space<vmem>>, %arg6: memref<32x5xbf16, #tpu.memory_space<vmem>>, %arg7: memref<1x5xf32, #tpu.memory_space<vmem>>, %arg8: memref<2x5xf32, #tpu.memory_space<vmem>>) attributes {dimension_semantics = [#tpu.dimension_semantics<parallel>], iteration_bounds = array<i64: 1>, scalar_prefetch = 0 : i64, scratch_operands = 0 : i64, tpu.core_type = #tpu.core_type<tc>, window_params = [{transform_indices = @transform_0, window_bounds = array<i64: 2, 32>}, {pipeline_mode = #tpu.pipeline_mode<synchronous>, transform_indices = @transform_1, window_bounds = array<i64: 32, 64>}, {pipeline_mode = #tpu.pipeline_mode<synchronous>, transform_indices = @transform_2, window_bounds = array<i64: 1, 64>}, {pipeline_mode = #tpu.pipeline_mode<synchronous>, transform_indices = @transform_3, window_bounds = array<i64: 64, 32>}, {pipeline_mode = #tpu.pipeline_mode<synchronous>, transform_indices = @transform_4, window_bounds = array<i64: 1, 32>}, {pipeline_mode = #tpu.pipeline_mode<synchronous>, transform_indices = @transform_5, window_bounds = array<i64: 32, 5>}, {pipeline_mode = #tpu.pipeline_mode<synchronous>, transform_indices = @transform_6, window_bounds = array<i64: 1, 5>}, {transform_indices = @transform_7, window_bounds = array<i64: 2, 5>}]} {
    %c0 = arith.constant 0 : index
    %c0_0 = arith.constant 0 : index
    %0 = vector.load %arg1[%c0, %c0_0] : memref<2x32xf32, #tpu.memory_space<vmem>>, vector<2x32xf32>
    %1 = arith.truncf %0 : vector<2x32xf32> to vector<2x32xbf16>
    %c0_1 = arith.constant 0 : index
    %c0_2 = arith.constant 0 : index
    %2 = vector.load %arg2[%c0_1, %c0_2] : memref<32x64xbf16, #tpu.memory_space<vmem>>, vector<32x64xbf16>
    %cst = arith.constant dense<0.000000e+00> : vector<2x64xf32>
    %3 = tpu.matmul %1, %2, %cst {dimension_numbers = #tpu.dot_dimension_numbers<[1], [0], [0], [1], [0, 0, 1, 1], [], []>} : vector<2x32xbf16>, vector<32x64xbf16>, vector<2x64xf32> -> vector<2x64xf32>
    %c0_3 = arith.constant 0 : index
    %c0_4 = arith.constant 0 : index
    %4 = vector.load %arg3[%c0_3, %c0_4] : memref<1x64xf32, #tpu.memory_space<vmem>>, vector<1x64xf32>
    %5 = vector.broadcast %4 : vector<1x64xf32> to vector<2x64xf32>
    %6 = arith.addf %3, %5 : vector<2x64xf32>
    %cst_5 = arith.constant 0.000000e+00 : f32
    %7 = vector.broadcast %cst_5 : f32 to vector<2x64xf32>
    %8 = arith.maximumf %6, %7 : vector<2x64xf32>
    %9 = arith.truncf %8 : vector<2x64xf32> to vector<2x64xbf16>
    %c0_6 = arith.constant 0 : index
    %c0_7 = arith.constant 0 : index
    %10 = vector.load %arg4[%c0_6, %c0_7] : memref<64x32xbf16, #tpu.memory_space<vmem>>, vector<64x32xbf16>
    %cst_8 = arith.constant dense<0.000000e+00> : vector<2x32xf32>
    %11 = tpu.matmul %9, %10, %cst_8 {dimension_numbers = #tpu.dot_dimension_numbers<[1], [0], [0], [1], [0, 0, 1, 1], [], []>} : vector<2x64xbf16>, vector<64x32xbf16>, vector<2x32xf32> -> vector<2x32xf32>
    %c0_9 = arith.constant 0 : index
    %c0_10 = arith.constant 0 : index
    %12 = vector.load %arg5[%c0_9, %c0_10] : memref<1x32xf32, #tpu.memory_space<vmem>>, vector<1x32xf32>
    %13 = vector.broadcast %12 : vector<1x32xf32> to vector<2x32xf32>
    %14 = arith.addf %11, %13 : vector<2x32xf32>
    %cst_11 = arith.constant 0.000000e+00 : f32
    %15 = vector.broadcast %cst_11 : f32 to vector<2x32xf32>
    %16 = arith.maximumf %14, %15 : vector<2x32xf32>
    %17 = arith.truncf %16 : vector<2x32xf32> to vector<2x32xbf16>
    %c0_12 = arith.constant 0 : index
    %c0_13 = arith.constant 0 : index
    %18 = vector.load %arg6[%c0_12, %c0_13] : memref<32x5xbf16, #tpu.memory_space<vmem>>, vector<32x5xbf16>
    %cst_14 = arith.constant dense<0.000000e+00> : vector<2x5xf32>
    %19 = tpu.matmul %17, %18, %cst_14 {dimension_numbers = #tpu.dot_dimension_numbers<[1], [0], [0], [1], [0, 0, 1, 1], [], []>} : vector<2x32xbf16>, vector<32x5xbf16>, vector<2x5xf32> -> vector<2x5xf32>
    %c0_15 = arith.constant 0 : index
    %c0_16 = arith.constant 0 : index
    %20 = vector.load %arg7[%c0_15, %c0_16] : memref<1x5xf32, #tpu.memory_space<vmem>>, vector<1x5xf32>
    %21 = vector.broadcast %20 : vector<1x5xf32> to vector<2x5xf32>
    %22 = arith.addf %19, %21 : vector<2x5xf32>
    %c0_17 = arith.constant 0 : index
    %c0_18 = arith.constant 0 : index
    %23 = vector.load %arg8[%c0_17, %c0_18] : memref<2x5xf32, #tpu.memory_space<vmem>>, vector<2x5xf32>
    tpu.vector_store %arg8[%c0_17, %c0_18], %22 {strides = array<i32>} : memref<2x5xf32, #tpu.memory_space<vmem>>, vector<2x5xf32>,
    return
  }
  func.func @transform_0(%arg0: i32) -> (i32, i32) {
    %c0_i32 = arith.constant 0 : i32
    %c0_i32_0 = arith.constant 0 : i32
    return %arg0, %c0_i32 : i32, i32
  }
  func.func @transform_1(%arg0: i32) -> (i32, i32) {
    %c0_i32 = arith.constant 0 : i32
    %c0_i32_0 = arith.constant 0 : i32
    %c0_i32_1 = arith.constant 0 : i32
    return %c0_i32, %c0_i32_0 : i32, i32
  }
  func.func @transform_2(%arg0: i32) -> (i32, i32) {
    %c0_i32 = arith.constant 0 : i32
    %c0_i32_0 = arith.constant 0 : i32
    %c0_i32_1 = arith.constant 0 : i32
    return %c0_i32, %c0_i32_0 : i32, i32
  }
  func.func @transform_3(%arg0: i32) -> (i32, i32) {
    %c0_i32 = arith.constant 0 : i32
    %c0_i32_0 = arith.constant 0 : i32
    %c0_i32_1 = arith.constant 0 : i32
    return %c0_i32, %c0_i32_0 : i32, i32
  }
  func.func @transform_4(%arg0: i32) -> (i32, i32) {
    %c0_i32 = arith.constant 0 : i32
    %c0_i32_0 = arith.constant 0 : i32
    %c0_i32_1 = arith.constant 0 : i32
    return %c0_i32, %c0_i32_0 : i32, i32
  }
  func.func @transform_5(%arg0: i32) -> (i32, i32) {
    %c0_i32 = arith.constant 0 : i32
    %c0_i32_0 = arith.constant 0 : i32
    %c0_i32_1 = arith.constant 0 : i32
    return %c0_i32, %c0_i32_0 : i32, i32
  }
  func.func @transform_6(%arg0: i32) -> (i32, i32) {
    %c0_i32 = arith.constant 0 : i32
    %c0_i32_0 = arith.constant 0 : i32
    %c0_i32_1 = arith.constant 0 : i32
    return %c0_i32, %c0_i32_0 : i32, i32
  }
  func.func @transform_7(%arg0: i32) -> (i32, i32) {
    %c0_i32 = arith.constant 0 : i32
    %c0_i32_0 = arith.constant 0 : i32
    return %arg0, %c0_i32 : i32, i32
  }
}

</mosaic_0001>

<bundles_post_ra>
// kernel: tpu_custom_call.1
= control target key start
LH: loop header
LB: loop body
LE: loop exit
PB: predicated region body
PF: predicated region fallthrough
CT: control target
= control target key end

     0   :  { %s333_s0 = inlined_call_operand.vmem [shape: f32[2,32], index: 0, kind: input, shape index: {}]   ;;  %s334_s1 = inlined_call_operand.vmem [shape: bf16[32,64], index: 1, kind: input, shape index: {}]   ;;  %s335_s2 = inlined_call_operand.vmem [shape: f32[1,64], index: 2, kind: input, shape index: {}]   ;;  %s336_s3 = inlined_call_operand.vmem [shape: bf16[64,32], index: 3, kind: input, shape index: {}]   ;;  %s337_s4 = inlined_call_operand.vmem [shape: f32[1,32], index: 4, kind: input, shape index: {}]   ;;  %s338_s5 = inlined_call_operand.vmem [shape: bf16[32,5], index: 5, kind: input, shape index: {}]   ;;  %s339_s6 = inlined_call_operand.vmem [shape: f32[1,5], index: 6, kind: input, shape index: {}]   ;;  %s340_s7 = inlined_call_operand.hbm [shape: f32[2,5], index: 7, kind: output, shape index: {}]  }
   0x1   :  { %v214_v0 = vld [vmem:[%s334_s1 + $0x8] sm:$0xff]  ;;  %v213_v1 = vld [vmem:[%s334_s1] sm:$0xff]  ;;  %v218_v2 = vld [vmem:[%s336_s3 + $0x18] sm:$0xff] }
   0x2   :  { %60 = vmatpush.bf16.msra.mxu0 %v214_v0  ;;  %v28_v3 = vld [vmem:[%s333_s0] sm:$0x3]  ;;  %113 = vmatpush.bf16.msra.mxu1 %v218_v2  ;;  %v217_v4 = vld [vmem:[%s336_s3 + $0x10] sm:$0xff] }
   0x3   :  { %12 = vsyncpa [#allocation3], 0  ;;  %v29_v5 = vpack.c.bf16 %v28_v3, %v28_v3  ;;  %vm50_vm0 = vcmask 261120   ;;  %v216_v6 = vld [vmem:[%s336_s3 + $0x8] sm:$0xff]  ;;  %v215_v7 = vld [vmem:[%s336_s3] sm:$0xff]  ;;  %vm105_vm1 = vcmask 523264  }
   0x4   :  { %v222_v8 = vld [vmem:[%s335_s2] ss:$0 sm:$0xff]  ;;  %v220_v14 = vld [vmem:[%s338_s5 + $0x8] sm:$0xff]  ;;  %s251_s21 = smov [#allocation2]   ;;  %s169_s24 = sshll.u32 %s340_s7, 4  ;;  %vm160_vm2 = vcmask 33792   ;;  %s170_s24 = int_to_ptr.hbm [resolvable:$true] %s169_s24 }
   0x5   :  { %153 = vmatpush.bf16.msra.mxu2 %v220_v14  ;;  %v219_v15 = vld [vmem:[%s338_s5] sm:$0xff]  ;;  %s167_s22 = sshll.u32 %s251_s21, 4  ;;  %s168_s22 = int_to_ptr.vmem [resolvable:$true] %s167_s22 }
   0x6   :  { %61 = vmatpush.bf16.msra.mxu0 %v213_v1  ;;  %114 = vmatpush.bf16.msra.mxu1 %v217_v4  ;;  %v223_v16 = vld [vmem:[%s337_s4] ss:$0 sm:$0xff] }
   0x7   :  { %v224_v22 = vld [vmem:[%s339_s6] ss:$0 sm:$0xff] }
   0x9   :  { %186 = vmatmul.msk.bf16.vlgmr.msra.gmra.mxu0 %vm50_vm0, %v29_v5  ;;  %154 = vmatpush.bf16.msra.mxu2 %v219_v15 }
   0xa   :  { %115 = vmatpush.bf16.msra.mxu1 %v216_v6 }
   0xe   :  { %116 = vmatpush.bf16.msra.mxu1 %v215_v7 }
  0x86   :  { %v63_v9 = vpop.f32.mrf.mxu0 }
  0x87   :  { %v64_v10 = vadd.f32 %v222_v8, %v63_v9 }
  0x89   :  { %v67_v11 = vmax.f32 %v64_v10, 0.0 }
  0x8b   :  { %v68_v12 = vpack.c.bf16 %v67_v11, %v67_v11 }
  0x8d   :  { %203 = vmatmul.msk.bf16.vlgmr.msra.gmra.mxu1 %vm105_vm1, %v68_v12 }
  0x8e   :  { %v65_v13 = vpop.f32.mrf.mxu0 }
 0x10a   :  { %v118_v17 = vpop.f32.mrf.mxu1 }
 0x10b   :  { %v119_v18 = vadd.f32 %v223_v16, %v118_v17 }
 0x10d   :  { %v122_v19 = vmax.f32 %v119_v18, 0.0 }
 0x10f   :  { %v123_v20 = vpack.c.bf16 %v122_v19, %v122_v19 }
 0x111   :  { %212 = vmatmul.msk.bf16.vlgmr.msra.gmra.mxu2 %vm50_vm0, %v123_v20 }
 0x112   :  { %v120_v21 = vpop.f32.mrf.mxu1 }
 0x194   :  { %v156_v23 = vpop.f32.mrf.mxu2 }
 0x195   :  { %v157_v24 = vadd.f32 %v224_v22, %v156_v23 }
 0x197   :  { %161 = vst.msk [vmem:[#allocation2] sm:$0x3] %vm160_vm2, %v157_v24 }
 0x198   :  { %172 = dma.vmem_to_hbm [thread:$0]  %s168_s22, 32, %s170_s24, [#allocation3]  }
 0x19c   :  { %v158_v25 = vpop.f32.mrf.mxu2 }
 0x19d   :  { %249 = dma.done.wait [#allocation3], 32  }
 0x19e   :  { %250 = vsyncadd [#allocation3], 4294967264 }
 0x19f   :  { %177 = vsyncpa [#allocation3], 1 }

</bundles_post_ra>
